<compile_context>
chip_gen: v6e
topology: v6e:2x2x1
jax: 0.10.0
libtpu: 0.0.40
codegen_flags: <defaults>
</compile_context>

<pallas_src>
import jax
import jax.numpy as jnp
from jax.experimental import pallas as pl
from jax.experimental.pallas import tpu as pltpu


def _mlp_kernel(u_ref, w1_ref, b1_ref, w2_ref, b2_ref, w3_ref, b3_ref, out_ref):
    """Fused MLP on a [1, TB] batch tile (batch on lanes)."""
    u_row = u_ref[...]                                        # [1, TB]

    # fc1: Linear(1, 20). K=1 -> VPU broadcast multiply (outer product).
    h1 = w1_ref[...] * u_row + b1_ref[...]                    # [20,1]*[1,TB] -> [20,TB]
    h1 = jnp.maximum(h1, 0.0)

    # fc2: Linear(20, 10). Small MXU matmul, batch on the lane (N) axis.
    h2 = jnp.dot(w2_ref[...], h1,
                 preferred_element_type=jnp.float32) + b2_ref[...]   # [10, TB]
    h2 = jnp.maximum(h2, 0.0)

    # fc3: Linear(10, 1). N=1 -> elementwise mul + sublane (XLU) reduce.
    y = jnp.sum(h2 * w3_ref[...], axis=0, keepdims=True) + b3_ref[...]  # [1, TB]

    out_ref[...] = y.astype(out_ref.dtype)


def gnn_forward(u, params, *, block_b=1024):
    """Pallas implementation of gNN.forward.

    u: [B, 1] float32.  Returns [B, 1] float32.
    """
    w1, b1, w2, b2, w3, b3 = params
    B = u.shape[0]

    # Lane-dense batch tiling:
    #  - tile must be a multiple of 128 lanes (vreg lane width),
    #  - never larger than the padded batch (avoids wasted compute on tiny B),
    #  - at least 128.
    b_pad128 = 128 * pl.cdiv(B, 128)
    block_b = max(128, min(128 * (int(block_b) // 128), b_pad128))
    n_blocks = pl.cdiv(B, block_b)
    Bp = n_blocks * block_b

    u_row = jnp.pad(u.reshape(1, B).astype(jnp.float32), ((0, 0), (0, Bp - B)))

    def const_spec(a):
        # Full-array block + constant index_map -> weights/biases stay
        # VMEM-resident across every grid step (no re-DMA).
        return pl.BlockSpec(a.shape, lambda i: tuple(0 for _ in a.shape))

    out = pl.pallas_call(
        _mlp_kernel,
        out_shape=jax.ShapeDtypeStruct((1, Bp), jnp.float32),
        grid=(n_blocks,),
        in_specs=[
            pl.BlockSpec((1, block_b), lambda i: (0, i)),     # u tile (lanes = batch)
            const_spec(w1), const_spec(b1),
            const_spec(w2), const_spec(b2),
            const_spec(w3), const_spec(b3),
        ],
        out_specs=pl.BlockSpec((1, block_b), lambda i: (0, i)),
        compiler_params=pltpu.CompilerParams(
            dimension_semantics=("parallel",)),
    )(u_row, w1, b1, w2, b2, w3, b3)

    return out[0, :B].reshape(B, 1)


def xavier_uniform(key, shape, fan_in, fan_out, dtype=jnp.float32):
    # Matches torch.nn.init.xavier_uniform_ (gain=1.0) for a Linear weight.
    limit = (6.0 / (fan_in + fan_out)) ** 0.5
    return jax.random.uniform(key, shape, dtype, minval=-limit, maxval=limit)


def init_params(key):
    k1, k2, k3 = jax.random.split(key, 3)
    # Stored directly in the transposed (feature-major, batch-on-lanes) compute layout.
    w1 = xavier_uniform(k1, (20, 1), fan_in=1, fan_out=20)    # fc1.weight   [20, 1]
    b1 = jnp.zeros((20, 1), jnp.float32)                      # fc1.bias     [20, 1]
    w2 = xavier_uniform(k2, (10, 20), fan_in=20, fan_out=10)  # fc2.weight   [10, 20]
    b2 = jnp.zeros((10, 1), jnp.float32)                      # fc2.bias     [10, 1]
    w3 = xavier_uniform(k3, (10, 1), fan_in=10, fan_out=1)    # fc3.weight^T [10, 1]
    b3 = jnp.zeros((1, 1), jnp.float32)                       # fc3.bias     [1, 1]
    return (w1, b1, w2, b2, w3, b3)


def reference_forward(u, params):
    """Plain-JAX reference in standard [B, feat] orientation."""
    w1, b1, w2, b2, w3, b3 = params
    h1 = jnp.maximum(u @ w1.T + b1.T, 0.0)     # [B, 20]
    h2 = jnp.maximum(h1 @ w2.T + b2.T, 0.0)    # [B, 10]
    return h2 @ w3 + b3.T                      # [B, 1]


if __name__ == "__main__":
    key = jax.random.PRNGKey(0)
    k_params, k_in1, k_in2 = jax.random.split(key, 3)

    params = init_params(k_params)

    # Small demo batch (exercises padding: 8 -> 128 lanes, single grid step).
    u_small = jax.random.normal(k_in1, (8, 1), jnp.float32)
    out_small = jax.block_until_ready(gnn_forward(u_small, params))
    ref_small = reference_forward(u_small, params)
    assert out_small.shape == (8, 1)
    assert jnp.allclose(out_small, ref_small, atol=1e-5, rtol=1e-5)

    # Multi-block grid check (non-multiple of the tile -> padding + 3 steps).
    u_big = jax.random.normal(k_in2, (300, 1), jnp.float32)
    out_big = jax.block_until_ready(gnn_forward(u_big, params, block_b=128))
    ref_big = reference_forward(u_big, params)
    assert out_big.shape == (300, 1)
    assert jnp.allclose(out_big, ref_big, atol=1e-5, rtol=1e-5)

    # Large-batch path (adaptive tile caps at 1024 lanes, 2 parallel steps).
    u_large = jax.random.normal(k_in2, (2000, 1), jnp.float32)
    out_large = jax.block_until_ready(gnn_forward(u_large, params))
    ref_large = reference_forward(u_large, params)
    assert out_large.shape == (2000, 1)
    assert jnp.allclose(out_large, ref_large, atol=1e-5, rtol=1e-5)

    print("KERNEL_OK")
</pallas_src>

<mosaic_0001>
module attributes {stable_mosaic.version = 11 : i64} {
  func.func @_mlp_kernel(%arg0: i32, %arg1: memref<1x128xf32, #tpu.memory_space<vmem>>, %arg2: memref<20x1xf32, #tpu.memory_space<vmem>>, %arg3: memref<20x1xf32, #tpu.memory_space<vmem>>, %arg4: memref<10x20xf32, #tpu.memory_space<vmem>>, %arg5: memref<10x1xf32, #tpu.memory_space<vmem>>, %arg6: memref<10x1xf32, #tpu.memory_space<vmem>>, %arg7: memref<1x1xf32, #tpu.memory_space<vmem>>, %arg8: memref<1x128xf32, #tpu.memory_space<vmem>>) attributes {dimension_semantics = [#tpu.dimension_semantics<parallel>], iteration_bounds = array<i64: 1>, scalar_prefetch = 0 : i64, scratch_operands = 0 : i64, tpu.core_type = #tpu.core_type<tc>, window_params = [{transform_indices = @transform_0, window_bounds = array<i64: 1, 128>}, {pipeline_mode = #tpu.pipeline_mode<synchronous>, transform_indices = @transform_1, window_bounds = array<i64: 20, 1>}, {pipeline_mode = #tpu.pipeline_mode<synchronous>, transform_indices = @transform_2, window_bounds = array<i64: 20, 1>}, {pipeline_mode = #tpu.pipeline_mode<synchronous>, transform_indices = @transform_3, window_bounds = array<i64: 10, 20>}, {pipeline_mode = #tpu.pipeline_mode<synchronous>, transform_indices = @transform_4, window_bounds = array<i64: 10, 1>}, {pipeline_mode = #tpu.pipeline_mode<synchronous>, transform_indices = @transform_5, window_bounds = array<i64: 10, 1>}, {pipeline_mode = #tpu.pipeline_mode<synchronous>, transform_indices = @transform_6, window_bounds = array<i64: 1, 1>}, {transform_indices = @transform_7, window_bounds = array<i64: 1, 128>}]} {
    %c0 = arith.constant 0 : index
    %c0_0 = arith.constant 0 : index
    %0 = vector.load %arg1[%c0, %c0_0] : memref<1x128xf32, #tpu.memory_space<vmem>>, vector<1x128xf32>
    %c0_1 = arith.constant 0 : index
    %c0_2 = arith.constant 0 : index
    %1 = vector.load %arg2[%c0_1, %c0_2] : memref<20x1xf32, #tpu.memory_space<vmem>>, vector<20x1xf32>
    %2 = vector.broadcast %1 : vector<20x1xf32> to vector<20x128xf32>
    %3 = vector.broadcast %0 : vector<1x128xf32> to vector<20x128xf32>
    %4 = arith.mulf %2, %3 : vector<20x128xf32>
    %c0_3 = arith.constant 0 : index
    %c0_4 = arith.constant 0 : index
    %5 = vector.load %arg3[%c0_3, %c0_4] : memref<20x1xf32, #tpu.memory_space<vmem>>, vector<20x1xf32>
    %6 = vector.broadcast %5 : vector<20x1xf32> to vector<20x128xf32>
    %7 = arith.addf %4, %6 : vector<20x128xf32>
    %cst = arith.constant 0.000000e+00 : f32
    %8 = vector.broadcast %cst : f32 to vector<20x128xf32>
    %9 = arith.maximumf %7, %8 : vector<20x128xf32>
    %c0_5 = arith.constant 0 : index
    %c0_6 = arith.constant 0 : index
    %10 = vector.load %arg4[%c0_5, %c0_6] : memref<10x20xf32, #tpu.memory_space<vmem>>, vector<10x20xf32>
    %cst_7 = arith.constant dense<0.000000e+00> : vector<10x128xf32>
    %11 = tpu.matmul %10, %9, %cst_7 {dimension_numbers = #tpu.dot_dimension_numbers<[1], [0], [0], [1], [0, 0, 1, 1], [], []>} : vector<10x20xf32>, vector<20x128xf32>, vector<10x128xf32> -> vector<10x128xf32>
    %c0_8 = arith.constant 0 : index
    %c0_9 = arith.constant 0 : index
    %12 = vector.load %arg5[%c0_8, %c0_9] : memref<10x1xf32, #tpu.memory_space<vmem>>, vector<10x1xf32>
    %13 = vector.broadcast %12 : vector<10x1xf32> to vector<10x128xf32>
    %14 = arith.addf %11, %13 : vector<10x128xf32>
    %cst_10 = arith.constant 0.000000e+00 : f32
    %15 = vector.broadcast %cst_10 : f32 to vector<10x128xf32>
    %16 = arith.maximumf %14, %15 : vector<10x128xf32>
    %c0_11 = arith.constant 0 : index
    %c0_12 = arith.constant 0 : index
    %17 = vector.load %arg6[%c0_11, %c0_12] : memref<10x1xf32, #tpu.memory_space<vmem>>, vector<10x1xf32>
    %18 = vector.broadcast %17 : vector<10x1xf32> to vector<10x128xf32>
    %19 = arith.mulf %16, %18 : vector<10x128xf32>
    %cst_13 = arith.constant dense<0.000000e+00> : vector<128xf32>
    %20 = vector.multi_reduction <add>, %19, %cst_13 [0] : vector<10x128xf32> to vector<128xf32>
    %21 = vector.shape_cast %20 : vector<128xf32> to vector<1x128xf32>
    %c0_14 = arith.constant 0 : index
    %c0_15 = arith.constant 0 : index
    %22 = vector.load %arg7[%c0_14, %c0_15] : memref<1x1xf32, #tpu.memory_space<vmem>>, vector<1x1xf32>
    %23 = vector.broadcast %22 : vector<1x1xf32> to vector<1x128xf32>
    %24 = arith.addf %21, %23 : vector<1x128xf32>
    %c0_16 = arith.constant 0 : index
    %c0_17 = arith.constant 0 : index
    %25 = vector.load %arg8[%c0_16, %c0_17] : memref<1x128xf32, #tpu.memory_space<vmem>>, vector<1x128xf32>
    tpu.vector_store %arg8[%c0_16, %c0_17], %24 {strides = array<i32>} : memref<1x128xf32, #tpu.memory_space<vmem>>, vector<1x128xf32>,
    return
  }
  func.func @transform_0(%arg0: i32) -> (i32, i32) {
    %c0_i32 = arith.constant 0 : i32
    %c0_i32_0 = arith.constant 0 : i32
    return %c0_i32, %arg0 : i32, i32
  }
  func.func @transform_1(%arg0: i32) -> (i32, i32) {
    %c0_i32 = arith.constant 0 : i32
    %c0_i32_0 = arith.constant 0 : i32
    %c0_i32_1 = arith.constant 0 : i32
    return %c0_i32, %c0_i32_0 : i32, i32
  }
  func.func @transform_2(%arg0: i32) -> (i32, i32) {
    %c0_i32 = arith.constant 0 : i32
    %c0_i32_0 = arith.constant 0 : i32
    %c0_i32_1 = arith.constant 0 : i32
    return %c0_i32, %c0_i32_0 : i32, i32
  }
  func.func @transform_3(%arg0: i32) -> (i32, i32) {
    %c0_i32 = arith.constant 0 : i32
    %c0_i32_0 = arith.constant 0 : i32
    %c0_i32_1 = arith.constant 0 : i32
    return %c0_i32, %c0_i32_0 : i32, i32
  }
  func.func @transform_4(%arg0: i32) -> (i32, i32) {
    %c0_i32 = arith.constant 0 : i32
    %c0_i32_0 = arith.constant 0 : i32
    %c0_i32_1 = arith.constant 0 : i32
    return %c0_i32, %c0_i32_0 : i32, i32
  }
  func.func @transform_5(%arg0: i32) -> (i32, i32) {
    %c0_i32 = arith.constant 0 : i32
    %c0_i32_0 = arith.constant 0 : i32
    %c0_i32_1 = arith.constant 0 : i32
    return %c0_i32, %c0_i32_0 : i32, i32
  }
  func.func @transform_6(%arg0: i32) -> (i32, i32) {
    %c0_i32 = arith.constant 0 : i32
    %c0_i32_0 = arith.constant 0 : i32
    %c0_i32_1 = arith.constant 0 : i32
    return %c0_i32, %c0_i32_0 : i32, i32
  }
  func.func @transform_7(%arg0: i32) -> (i32, i32) {
    %c0_i32 = arith.constant 0 : i32
    %c0_i32_0 = arith.constant 0 : i32
    return %c0_i32, %arg0 : i32, i32
  }
}

</mosaic_0001>

<bundles_post_ra>
// kernel: tpu_custom_call.1
= control target key start
LH: loop header
LB: loop body
LE: loop exit
PB: predicated region body
PF: predicated region fallthrough
CT: control target
= control target key end

     0   :  { %s365_s0 = inlined_call_operand.vmem [shape: f32[1,128], index: 0, kind: input, shape index: {}]   ;;  %s366_s1 = inlined_call_operand.vmem [shape: f32[20,1], index: 1, kind: input, shape index: {}]   ;;  %s367_s2 = inlined_call_operand.vmem [shape: f32[20,1], index: 2, kind: input, shape index: {}]   ;;  %s368_s3 = inlined_call_operand.vmem [shape: f32[10,20], index: 3, kind: input, shape index: {}]   ;;  %s369_s4 = inlined_call_operand.vmem [shape: f32[10,1], index: 4, kind: input, shape index: {}]   ;;  %s370_s5 = inlined_call_operand.vmem [shape: f32[10,1], index: 5, kind: input, shape index: {}]   ;;  %s371_s6 = inlined_call_operand.<no memory space> [shape: f32[1,1], index: 6, kind: input, shape index: {}]   ;;  %s372_s7 = inlined_call_operand.hbm [shape: f32[1,128], index: 7, kind: output, shape index: {}]  }
   0x1   :  { %v12_v0 = vstv %s371_s6 }
   0x2   :  { %13 = vst [vmem:[#allocation2] sm:$0x1] %v12_v0 }
   0x3   :  { %v59_v1 = vld [vmem:[%s367_s2 + $0x10] sm:$0xf]  ;;  %v276_v3 = vmov 0   ;;  %v31_v4 = vld [vmem:[%s366_s1 + $0x8] sm:$0xff]  ;;  %v30_v5 = vld [vmem:[%s366_s1] sm:$0xff] }
   0x4   :  { %v32_v2 = vld [vmem:[%s366_s1 + $0x10] sm:$0xf]  ;;  %253 = vset.pattern.permute.xlu1 %v276_v3  ;;  %252 = vset.pattern.permute.xlu0 %v276_v3 }
   0x5   :  { %72 = vperm.xlu1 %253, %v59_v1   ;;  %45 = vperm.xlu0 %252, %v32_v2  }
   0x6   :  { %14 = vsyncpa [#allocation4], 0  ;;  %v58_v6 = vld [vmem:[%s367_s2 + $0x8] sm:$0xff]  ;;  %v57_v7 = vld [vmem:[%s367_s2] sm:$0xff]  ;;  %vm95_vm0 = vcmask 162816   ;;  %vm102_vm1 = vcmask 1043456   ;;  %v212_v44 = vlaneseq }
   0x7   :  { %v84_v8 = vld [vmem:[%s369_s4 + $0x8] sm:$0x3]  ;;  %v83_v9 = vld [vmem:[%s369_s4] sm:$0xff]  ;;  %vm197_vm2 = vcmask 1041408  }
   0x8   :  { %v81_v10 = vld [vmem:[%s368_s3] sm:$0xff]  ;;  %v184_v11 = vld [vmem:[%s370_s5 + $0x8] sm:$0x3]  ;;  %v213_v47 = vshrl.u32 %v212_v44, 7 }
   0x9   :  { %40 = vperm.xlu0 %252, %v31_v4   ;;  %35 = vperm.xlu1 %253, %v30_v5   ;;  %v183_v12 = vld [vmem:[%s370_s5] sm:$0xff]  ;;  %v82_v30 = vld [vmem:[%s368_s3 + $0x8] sm:$0x3]  ;;  %s277_s3 = smov [#allocation3]  }
   0xa   :  { %247 = vmatprep.mubr.msk.f32.mxu0 %vm95_vm0, %v81_v10  ;;  %v206_v13 = vld [vmem:[#allocation2] sm:$0x1]  ;;  %v214_v50 = vsub.s32 0, %v213_v47  ;;  %s224_s23 = sshll.u32 %s277_s3, 4  ;;  %s225_s23 = int_to_ptr.vmem [resolvable:$true] %s224_s23 }
   0xb   :  { %v232_v14 = vld [vmem:[%s365_s0] ss:$0 sm:$0xff]  ;;  %s254_s24 = scalar_lea.vmem %s225_s23, 16  ;;  %s258_s25 = scalar_lea.vmem %s225_s23, 32 }
   0xc   :  { %p255_p0 = scmp.ne.s32.totalorder %s225_s23, %s254_s24  ;;  %p259_p1 = scmp.lt.s32.totalorder %s225_s23, %s225_s23 }
   0xd   :  { %67 = vperm.xlu0 %252, %v58_v6   ;;  %62 = vperm.xlu1 %253, %v57_v7   ;;  %p260_p2 = scmp.lt.s32.totalorder %s258_s25, %s254_s24 }
   0xf   :  { %p261_p3 = por %p260_p2, %p259_p1 }
  0x11   :  { %92 = vperm.xlu0 %252, %v84_v8   ;;  %87 = vperm.xlu1 %253, %v83_v9   ;;  %p262_p4 = pnand %p261_p3, %p255_p0 }
  0x15   :  { %192 = vperm.xlu0 %252, %v184_v11   ;;  %187 = vperm.xlu1 %253, %v183_v12  }
  0x19   :  { %209 = vperm.xlu0 %252, %v206_v13  }
  0x80   :  { %v73_v15 = vpop.permute.xlu1 %72  ;;  %v46_v16 = vpop.permute.xlu0 %45 }
  0x81   :  { %v56_v17 = vmul.f32 %v232_v14, %v46_v16 }
  0x83   :  { %v77_v18 = vadd.f32 %v73_v15, %v56_v17 }
  0x84   :  { %v41_v19 = vpop.permute.xlu0 %40  ;;  %v36_v20 = vpop.permute.xlu1 %35 }
  0x85   :  { %v80_v21 = vmax.f32 %v77_v18, 0.0  ;;  %v55_v22 = vmul.f32 %v232_v14, %v41_v19  ;;  %v54_v23 = vmul.f32 %v232_v14, %v36_v20 }
  0x87   :  { %241 = vmatprep.subr.msk.mxu0 %vm102_vm1, %v80_v21 }
  0x88   :  { %v68_v24 = vpop.permute.xlu0 %67  ;;  %v63_v25 = vpop.permute.xlu1 %62  ;;  %242 = vmatpush3.msk.msra.mxu0 %vm102_vm1, %v80_v21 }
  0x89   :  { %v76_v26 = vadd.f32 %v68_v24, %v55_v22  ;;  %v75_v27 = vadd.f32 %v63_v25, %v54_v23 }
  0x8b   :  { %v79_v28 = vmax.f32 %v76_v26, 0.0  ;;  %v78_v29 = vmax.f32 %v75_v27, 0.0 }
  0x8c   :  { %v93_v31 = vpop.permute.xlu0 %92  ;;  %v88_v32 = vpop.permute.xlu1 %87 }
  0x8d   :  { %243 = vmatprep.subr.mxu0 %v79_v28 }
  0x8e   :  { %244 = vmatpush3.msra.mxu0 %v79_v28 }
  0x8f   :  { %245 = vmatprep.subr.mxu0 %v78_v29 }
  0x90   :  { %246 = vmatpush3.msra.mxu0 %v78_v29  ;;  %v193_v38 = vpop.permute.xlu0 %192  ;;  %v188_v41 = vpop.permute.xlu1 %187 }
  0x91   :  { %248 = vmatmul.mubr.msk.f32.vlgmr.msra.gmra.mxu0 %vm95_vm0, %v82_v30 }
  0x94   :  { %v210_v52 = vpop.permute.xlu0 %209 }
  0x95   :  { %v215_v54 = vrot.slane %v210_v52, %v214_v50 }
 0x151   :  { %v249_v33 = vpop.f32.mrf.mxu0 }
 0x152   :  { %v178_v34 = vadd.f32 %v249_v33, %v93_v31 }
 0x153   :  { %v172_v35 = vpop.f32.mrf.mxu0 }
 0x154   :  { %v182_v36 = vmax.f32 %v178_v34, 0.0  ;;  %v173_v37 = vadd.f32 %v172_v35, %v88_v32 }
 0x156   :  { %v196_v39 = vmul.f32 %v193_v38, %v182_v36  ;;  %v181_v40 = vmax.f32 %v173_v37, 0.0 }
 0x158   :  { %v198_v42 = vsel %vm197_vm2, %v196_v39, 0.0  ;;  %v195_v43 = vmul.f32 %v188_v41, %v181_v40 }
 0x15a   :  { %v199_v45 = vadd.f32 %v198_v42, %v195_v43 }
 0x15c   :  { %v200_v46 = vrot.slane %v199_v45, 4 }
 0x15e   :  { %v201_v48 = vadd.f32 %v200_v46, %v199_v45 }
 0x160   :  { %v202_v49 = vrot.slane %v201_v48, 2 }
 0x162   :  { %v203_v51 = vadd.f32 %v202_v49, %v201_v48 }
 0x164   :  { %v204_v53 = vrot.slane %v203_v51, 1 }
 0x166   :  { %v205_v55 = vadd.f32 %v204_v53, %v203_v51 }
 0x168   :  { %v216_v56 = vadd.f32 %v215_v54, %v205_v55 }
 0x16a   :  { %217 = vst [vmem:[#allocation3] sm:$0x1] %v216_v56 }
 0x16b   :  { %265 = shalt.err (!%p262_p4)
}
 0x16c   :  { %227 = dma.vmem_to_hbm [thread:$0]  %s225_s23, 16, %s372_s7, [#allocation4]  }
 0x16d   :  { %274 = dma.done.wait [#allocation4], 16  }
 0x16e   :  { %275 = vsyncadd [#allocation4], 4294967280 }
 0x16f   :  { %231 = vsyncpa [#allocation4], 1 }

</bundles_post_ra>
